<compile_context>
chip_gen: v7x
topology: tpu7x:2x2x1
jax: 0.10.0
libtpu: 0.0.40
codegen_flags: <defaults>
</compile_context>

<pallas_src>
import functools

import jax
import jax.numpy as jnp
from jax.experimental import pallas as pl
from jax.experimental.pallas import tpu as pltpu


def _round_up(x, m):
    return ((x + m - 1) // m) * m


def _vmem_capacity_bytes():
    cap = 64 << 20  # conservative fallback (v7x per-TC size; fits every gen)
    try:
        cap = int(getattr(pltpu.get_tpu_info(), "vmem_capacity_bytes", cap))
    except Exception:
        pass
    return cap


def _vmem_budget_bytes(vmem_budget=None):
    if vmem_budget is not None:
        return int(vmem_budget)
    cap = _vmem_capacity_bytes()
    # ~5/8 of physical VMEM (v7x: ~40 MiB of 64; v5e/v6e capped at 64 of 128),
    # leaving headroom for compiler scratch.
    return max(24 << 20, min(cap * 5 // 8, 64 << 20))


def _plan_k(F, N_pad, w_itemsize, *, k_tile, budget):
    """Decide the K (reduction) tiling: (TK, num_k, F_pad)."""
    if k_tile is None:
        resident = 2 * (F * N_pad + N_pad) * w_itemsize  # double-buffered W^T + bias
        if resident <= budget // 2:
            return F, 1, F  # whole K resident, no padding anywhere
        tk = ((budget // 2) // (2 * N_pad * w_itemsize)) // 128 * 128
        k_tile = int(max(128, min(tk, _round_up(F, 128))))
    else:
        k_tile = int(k_tile)
        if k_tile < F and k_tile % 128 != 0:
            raise ValueError("k_tile must be a multiple of 128 when it tiles K")
    F_pad = _round_up(F, k_tile)
    return k_tile, F_pad // k_tile, F_pad


def _plan_batch(B, TK, N_pad, x_isz, o_isz, w_isz, budget, *,
                batch_tile=None, row_align=8):
    """Decide the batch tile TB and the batch grid size."""
    if batch_tile is not None:
        TB = int(batch_tile)
    else:
        w_bytes = 2 * (TK * N_pad + N_pad) * w_isz            # double-buffered residents
        per_row = 2 * TK * x_isz + 2 * N_pad * o_isz + N_pad * 4  # x + out (dbuf) + f32 acc
        avail = max(budget - w_bytes, per_row * row_align)
        TB = int((avail // per_row) // row_align * row_align)
        TB = max(row_align, min(TB, 1024))
        # Ensure >= 4 grid steps for large batches so v7x's two TensorCores
        # both get work; no effect on small batches.
        TB = min(TB, max(128, _round_up(pl.cdiv(B, 4), row_align)))
    if TB >= B:
        return B, 1
    return TB, pl.cdiv(B, TB)


def _dig_kernel(x_ref, wt_ref, b_ref, out_ref, acc_ref, *, units):
    k = pl.program_id(1)

    @pl.when(k == 0)
    def _():
        acc_ref[...] = jnp.zeros_like(acc_ref)

    # (TB, TK) @ (TK, N_pad) with f32 accumulation on the MXU.
    acc_ref[...] += jnp.dot(x_ref[...], wt_ref[...],
                            preferred_element_type=jnp.float32)

    @pl.when(k == pl.num_programs(1) - 1)
    def _():
        acc = acc_ref[...] + b_ref[...].astype(jnp.float32)

        # Per-column head masks via boundary compares (no int division):
        # cols [0,u)=mu, [u,2u)=nu, [2u,3u)=alpha, [3u,4u)=beta, >=4u padding.
        col = jax.lax.broadcasted_iota(jnp.int32, acc.shape, dimension=1)
        is_mu = col < units
        is_alpha = (col >= 2 * units) & (col < 3 * units)

        # Numerically stable softplus over the lane-dense block
        # (exp/log1p on the EUP, max/abs/select on the VPU — hidden under MXU).
        sp = jnp.maximum(acc, 0.0) + jnp.log1p(jnp.exp(-jnp.abs(acc)))

        res = jnp.where(is_mu, acc, sp)          # mu passes through untouched
        res = jnp.where(is_alpha, res + 2.0, res)  # alpha = softplus + 2
        out_ref[...] = res.astype(out_ref.dtype)


def pack_params(weight, bias, *, units, k_tile=None, vmem_budget=None,
                param_dtype=None):
    """Pack PyTorch-layout Linear params once, off the hot path.

    weight: (4*units, F), bias: (4*units,)  ->  (wt (F_pad, N_pad), b (1, N_pad), k_tile)
    """
    N = 4 * units
    F = weight.shape[1]
    assert weight.shape == (N, F) and bias.shape == (N,)
    dtype = param_dtype if param_dtype is not None else weight.dtype
    N_pad = _round_up(N, 128)
    budget = _vmem_budget_bytes(vmem_budget)
    TK, _, F_pad = _plan_k(F, N_pad, jnp.dtype(dtype).itemsize,
                           k_tile=k_tile, budget=budget)
    wt = jnp.zeros((F_pad, N_pad), dtype).at[:F, :N].set(weight.T.astype(dtype))
    b = jnp.zeros((1, N_pad), dtype).at[0, :N].set(bias.astype(dtype))
    return wt, b, TK


def dense_inverse_gamma_packed(x, wt, b, *, units, k_tile=None,
                               vmem_budget=None, batch_tile=None):
    """x: (B, F); wt: (F_pad, N_pad) packed W^T; b: (1, N_pad).

    Returns (mu, nu, alpha, beta), each (B, units).
    """
    B, F = x.shape
    F_pad, N_pad = wt.shape
    N = 4 * units
    assert N <= N_pad and F <= F_pad and b.shape == (1, N_pad)

    x_isz = jnp.dtype(x.dtype).itemsize
    w_isz = jnp.dtype(wt.dtype).itemsize
    o_isz = x_isz
    budget = _vmem_budget_bytes(vmem_budget)

    TK = F_pad if k_tile is None else int(k_tile)
    assert F_pad % TK == 0, "packed weight K dim must be a multiple of k_tile"
    num_k = F_pad // TK

    # Only the (rare) K-tiled / huge-F path needs x padded along K; the
    # resident path feeds x to the kernel completely untouched.
    if F_pad > F:
        x = jnp.pad(x, ((0, 0), (0, F_pad - F)))

    row_align = 8 if x_isz >= 4 else (16 if x_isz == 2 else 32)
    TB, grid_b = _plan_batch(B, TK, N_pad, x_isz, o_isz, w_isz, budget,
                             batch_tile=batch_tile, row_align=row_align)

    usage = (2 * TB * TK * x_isz + 2 * TB * N_pad * o_isz
             + 2 * (TK * N_pad + N_pad) * w_isz + TB * N_pad * 4)
    vmem_limit = int(min(max(usage + (8 << 20), 32 << 20), _vmem_capacity_bytes()))

    cost = pl.CostEstimate(
        flops=2 * B * F_pad * N_pad,
        transcendentals=2 * B * N_pad,  # exp + log1p per output element
        bytes_accessed=(B * F_pad * x_isz + (F_pad * N_pad + N_pad) * w_isz
                        + B * N_pad * o_isz),
    )

    out = pl.pallas_call(
        functools.partial(_dig_kernel, units=units),
        out_shape=jax.ShapeDtypeStruct((B, N_pad), x.dtype),
        grid=(grid_b, num_k),
        in_specs=[
            pl.BlockSpec((TB, TK), lambda i, k: (i, k)),      # x: batch x K tiles
            pl.BlockSpec((TK, N_pad), lambda i, k: (k, 0)),   # packed W^T
            pl.BlockSpec((1, N_pad), lambda i, k: (0, 0)),    # bias: resident
        ],
        out_specs=pl.BlockSpec((TB, N_pad), lambda i, k: (i, 0)),
        scratch_shapes=[pltpu.VMEM((TB, N_pad), jnp.float32)],
        compiler_params=pltpu.CompilerParams(
            dimension_semantics=("parallel", "arbitrary"),
            vmem_limit_bytes=vmem_limit,
        ),
        cost_estimate=cost,
    )(x, wt, b)

    mu = out[:, 0 * units:1 * units]
    nu = out[:, 1 * units:2 * units]
    alpha = out[:, 2 * units:3 * units]
    beta = out[:, 3 * units:4 * units]
    return mu, nu, alpha, beta


def dense_inverse_gamma(x, weight, bias, *, units, vmem_budget=None):
    """Convenience wrapper taking PyTorch Linear layout. Packs per call —
    prefer pack_params() + dense_inverse_gamma_packed() inside training loops."""
    wt, b, tk = pack_params(weight, bias, units=units, vmem_budget=vmem_budget)
    return dense_inverse_gamma_packed(x, wt, b, units=units, k_tile=tk,
                                      vmem_budget=vmem_budget)


def _reference(x, weight, bias, *, units):
    out = x @ weight.T + bias
    mu = out[..., 0 * units:1 * units]
    logv = out[..., 1 * units:2 * units]
    logalpha = out[..., 2 * units:3 * units]
    logbeta = out[..., 3 * units:4 * units]
    return (mu,
            jax.nn.softplus(logv),
            jax.nn.softplus(logalpha) + 2.0,
            jax.nn.softplus(logbeta))


if __name__ == "__main__":
    key = jax.random.PRNGKey(0)

    def make_case(k, batch, in_features, units):
        kx, kw, kb = jax.random.split(k, 3)
        x = jax.random.normal(kx, (batch, in_features), dtype=jnp.float32)
        bound = 1.0 / jnp.sqrt(float(in_features))
        w = jax.random.uniform(kw, (4 * units, in_features),
                               minval=-bound, maxval=bound, dtype=jnp.float32)
        b = jax.random.uniform(kb, (4 * units,),
                               minval=-bound, maxval=bound, dtype=jnp.float32)
        return x, w, b

    k1, k2 = jax.random.split(key)

    # Case 1: resident-weight fast path — x is never padded or copied.
    batch, in_features, units = 8, 32, 2
    x, w, b = make_case(k1, batch, in_features, units)
    wt, bp, tk = pack_params(w, b, units=units)  # pack once, off the hot path
    fwd = jax.jit(functools.partial(dense_inverse_gamma_packed,
                                    units=units, k_tile=tk))
    outs = fwd(x, wt, bp)
    jax.block_until_ready(outs)
    for got, want in zip(outs, _reference(x, w, b, units=units)):
        assert got.shape == (batch, units)
        assert jnp.allclose(got, want, atol=1e-5, rtol=1e-5)

    # Case 2: forced K-tiling + ragged batch blocks (accumulator path).
    batch, in_features, units = 20, 160, 3
    x, w, b = make_case(k2, batch, in_features, units)
    wt, bp, tk = pack_params(w, b, units=units, k_tile=128)
    outs = dense_inverse_gamma_packed(x, wt, bp, units=units, k_tile=tk,
                                      batch_tile=8)
    jax.block_until_ready(outs)
    for got, want in zip(outs, _reference(x, w, b, units=units)):
        assert got.shape == (batch, units)
        assert jnp.allclose(got, want, atol=1e-5, rtol=1e-5)

    print("KERNEL_OK")
</pallas_src>

<mosaic_0001>
module attributes {stable_mosaic.version = 11 : i64} {
  func.func @_dig_kernel(%arg0: i32, %arg1: i32, %arg2: memref<8x32xf32, #tpu.memory_space<vmem>>, %arg3: memref<32x128xf32, #tpu.memory_space<vmem>>, %arg4: memref<1x128xf32, #tpu.memory_space<vmem>>, %arg5: memref<8x128xf32, #tpu.memory_space<vmem>>, %arg6: memref<8x128xf32, #tpu.memory_space<vmem>>) attributes {dimension_semantics = [#tpu.dimension_semantics<parallel>, #tpu.dimension_semantics<arbitrary>], iteration_bounds = array<i64: 1, 1>, scalar_prefetch = 0 : i64, scratch_operands = 1 : i64, tpu.core_type = #tpu.core_type<tc>, window_params = [{transform_indices = @transform_0, window_bounds = array<i64: 8, 32>}, {transform_indices = @transform_1, window_bounds = array<i64: 32, 128>}, {pipeline_mode = #tpu.pipeline_mode<synchronous>, transform_indices = @transform_2, window_bounds = array<i64: 1, 128>}, {transform_indices = @transform_3, window_bounds = array<i64: 8, 128>}]} {
    %c0_i32 = arith.constant 0 : i32
    %0 = arith.cmpi eq, %arg1, %c0_i32 : i32
    %1 = arith.extui %0 : i1 to i32
    %c0_i32_0 = arith.constant 0 : i32
    %2 = arith.cmpi ne, %1, %c0_i32_0 : i32
    scf.if %2 {
      %cst_10 = arith.constant 0.000000e+00 : f32
      %12 = vector.broadcast %cst_10 : f32 to vector<8x128xf32>
      %c0_11 = arith.constant 0 : index
      %c0_12 = arith.constant 0 : index
      %13 = vector.load %arg6[%c0_11, %c0_12] : memref<8x128xf32, #tpu.memory_space<vmem>>, vector<8x128xf32>
      tpu.vector_store %arg6[%c0_11, %c0_12], %12 {strides = array<i32>} : memref<8x128xf32, #tpu.memory_space<vmem>>, vector<8x128xf32>,
    } else {
    }
    %c0 = arith.constant 0 : index
    %c0_1 = arith.constant 0 : index
    %3 = vector.load %arg6[%c0, %c0_1] : memref<8x128xf32, #tpu.memory_space<vmem>>, vector<8x128xf32>
    %c0_2 = arith.constant 0 : index
    %c0_3 = arith.constant 0 : index
    %4 = vector.load %arg2[%c0_2, %c0_3] : memref<8x32xf32, #tpu.memory_space<vmem>>, vector<8x32xf32>
    %c0_4 = arith.constant 0 : index
    %c0_5 = arith.constant 0 : index
    %5 = vector.load %arg3[%c0_4, %c0_5] : memref<32x128xf32, #tpu.memory_space<vmem>>, vector<32x128xf32>
    %cst = arith.constant dense<0.000000e+00> : vector<8x128xf32>
    %6 = tpu.matmul %4, %5, %cst {dimension_numbers = #tpu.dot_dimension_numbers<[1], [0], [0], [1], [0, 0, 1, 1], [], []>} : vector<8x32xf32>, vector<32x128xf32>, vector<8x128xf32> -> vector<8x128xf32>
    %7 = arith.addf %3, %6 : vector<8x128xf32>
    %c0_6 = arith.constant 0 : index
    %c0_7 = arith.constant 0 : index
    %8 = vector.load %arg6[%c0_6, %c0_7] : memref<8x128xf32, #tpu.memory_space<vmem>>, vector<8x128xf32>
    tpu.vector_store %arg6[%c0_6, %c0_7], %7 {strides = array<i32>} : memref<8x128xf32, #tpu.memory_space<vmem>>, vector<8x128xf32>,
    %c0_i32_8 = arith.constant 0 : i32
    %9 = arith.cmpi eq, %arg1, %c0_i32_8 : i32
    %10 = arith.extui %9 : i1 to i32
    %c0_i32_9 = arith.constant 0 : i32
    %11 = arith.cmpi ne, %10, %c0_i32_9 : i32
    scf.if %11 {
      %c0_10 = arith.constant 0 : index
      %c0_11 = arith.constant 0 : index
      %12 = vector.load %arg6[%c0_10, %c0_11] : memref<8x128xf32, #tpu.memory_space<vmem>>, vector<8x128xf32>
      %c0_12 = arith.constant 0 : index
      %c0_13 = arith.constant 0 : index
      %13 = vector.load %arg4[%c0_12, %c0_13] : memref<1x128xf32, #tpu.memory_space<vmem>>, vector<1x128xf32>
      %14 = vector.broadcast %13 : vector<1x128xf32> to vector<8x128xf32>
      %15 = arith.addf %12, %14 : vector<8x128xf32>
      %16 = tpu.iota {dimensions = array<i32: 1>} : vector<8x128xi32>
      %c2_i32 = arith.constant 2 : i32
      %17 = vector.broadcast %c2_i32 : i32 to vector<8x128xi32>
      %18 = arith.cmpi slt, %16, %17 : vector<8x128xi32>
      %c4_i32 = arith.constant 4 : i32
      %19 = vector.broadcast %c4_i32 : i32 to vector<8x128xi32>
      %20 = arith.cmpi sge, %16, %19 : vector<8x128xi32>
      %c6_i32 = arith.constant 6 : i32
      %21 = vector.broadcast %c6_i32 : i32 to vector<8x128xi32>
      %22 = arith.cmpi slt, %16, %21 : vector<8x128xi32>
      %23 = arith.andi %20, %22 : vector<8x128xi1>
      %cst_14 = arith.constant 0.000000e+00 : f32
      %24 = vector.broadcast %cst_14 : f32 to vector<8x128xf32>
      %25 = arith.maximumf %15, %24 : vector<8x128xf32>
      %26 = math.absf %15 : vector<8x128xf32>
      %cst_15 = arith.constant 0.000000e+00 : f32
      %27 = vector.broadcast %cst_15 : f32 to vector<8x128xf32>
      %28 = arith.subf %27, %26 : vector<8x128xf32>
      %29 = math.exp %28 : vector<8x128xf32>
      %30 = math.log1p %29 : vector<8x128xf32>
      %31 = arith.addf %25, %30 : vector<8x128xf32>
      %32 = arith.select %18, %15, %31 : vector<8x128xi1>, vector<8x128xf32>
      %cst_16 = arith.constant 2.000000e+00 : f32
      %33 = vector.broadcast %cst_16 : f32 to vector<8x128xf32>
      %34 = arith.addf %32, %33 : vector<8x128xf32>
      %35 = arith.select %23, %34, %32 : vector<8x128xi1>, vector<8x128xf32>
      %c0_17 = arith.constant 0 : index
      %c0_18 = arith.constant 0 : index
      %36 = vector.load %arg5[%c0_17, %c0_18] : memref<8x128xf32, #tpu.memory_space<vmem>>, vector<8x128xf32>
      tpu.vector_store %arg5[%c0_17, %c0_18], %35 {strides = array<i32>} : memref<8x128xf32, #tpu.memory_space<vmem>>, vector<8x128xf32>,
    } else {
    }
    return
  }
  func.func @transform_0(%arg0: i32, %arg1: i32) -> (i32, i32) {
    %c0_i32 = arith.constant 0 : i32
    return %arg0, %arg1 : i32, i32
  }
  func.func @transform_1(%arg0: i32, %arg1: i32) -> (i32, i32) {
    %c0_i32 = arith.constant 0 : i32
    %c0_i32_0 = arith.constant 0 : i32
    return %arg1, %c0_i32 : i32, i32
  }
  func.func @transform_2(%arg0: i32, %arg1: i32) -> (i32, i32) {
    %c0_i32 = arith.constant 0 : i32
    %c0_i32_0 = arith.constant 0 : i32
    %c0_i32_1 = arith.constant 0 : i32
    return %c0_i32, %c0_i32_0 : i32, i32
  }
  func.func @transform_3(%arg0: i32, %arg1: i32) -> (i32, i32) {
    %c0_i32 = arith.constant 0 : i32
    %c0_i32_0 = arith.constant 0 : i32
    return %arg0, %c0_i32 : i32, i32
  }
}

</mosaic_0001>

<bundles_post_ra>
// kernel: dense_inverse_gamma_packed.1
= control target key start
LH: loop header
LB: loop body
LE: loop exit
PB: predicated region body
PF: predicated region fallthrough
CT: control target
= control target key end

     0   :  { %8 = vsyncpa [#allocation4], 0  ;;  %s317_s0 = inlined_call_operand.hbm [shape: f32[8,32], index: 0, kind: input, shape index: {}]   ;;  %s318_s1 = inlined_call_operand.hbm [shape: f32[32,128], index: 1, kind: input, shape index: {}]   ;;  %s319_s2 = inlined_call_operand.vmem [shape: f32[1,128], index: 2, kind: input, shape index: {}]   ;;  %s320_s3 = inlined_call_operand.vmem [shape: f32[8,128], index: 3, kind: output, shape index: {}]  }
   0x1   :  { %9 = vsyncpa [#allocation6], 0  ;;  %s253_s12 = smov [#allocation3]   ;;  %s254_s14 = smov [#allocation5]  }
   0x2   :  { %s16_s13 = sshll.u32 %s253_s12, 4  ;;  %s25_s15 = sshll.u32 %s254_s14, 4  ;;  %s17_s13 = int_to_ptr.vmem [resolvable:$true] %s16_s13  ;;  %s280_s15 = int_to_ptr.vmem [resolvable:$true] %s25_s15 }
   0x3   :  { %s205_s18 = scalar_lea.hbm %s317_s0, 128 }
   0x4   :  { %p206_p0 = scmp.ne.s32.totalorder %s317_s0, %s205_s18  ;;  %p209_p1 = scmp.lt.u32.totalorder %s205_s18, %s317_s0 }
   0x6   :  { %p211_p2 = pnand %p209_p1, %p206_p0 }
   0x8   :  { %214 = shalt.err (!%p211_p2)
}
   0x9   :  { %s215_s23 = scalar_lea.vmem %s17_s13, 128  ;;  %p220_p4 = scmp.lt.s32.totalorder %s17_s13, %s17_s13 }
   0xa   :  { %p216_p3 = scmp.ne.s32.totalorder %s17_s13, %s215_s23  ;;  %p221_p5 = scmp.lt.s32.totalorder %s215_s23, %s215_s23 }
   0xc   :  { %p222_p6 = por %p221_p5, %p220_p4 }
   0xe   :  { %p223_p7 = pnand %p222_p6, %p216_p3 }
  0x10   :  { %226 = shalt.err (!%p223_p7)
}
  0x11   :  { %19 = dma.hbm_to_vmem [thread:$0]  %s317_s0, 128, %s17_s13, [#allocation4]  }
  0x12   :  { %s227_s28 = scalar_lea.hbm %s318_s1, 512 }
  0x13   :  { %p228_p8 = scmp.ne.s32.totalorder %s318_s1, %s227_s28  ;;  %p231_p9 = scmp.lt.u32.totalorder %s227_s28, %s318_s1 }
  0x15   :  { %p233_p10 = pnand %p231_p9, %p228_p8 }
  0x17   :  { %236 = shalt.err (!%p233_p10)
}
  0x18   :  { %s237_s6 = scalar_lea.vmem %s280_s15, 512  ;;  %p242_p12 = scmp.lt.s32.totalorder %s280_s15, %s280_s15 }
  0x19   :  { %p238_p11 = scmp.ne.s32.totalorder %s280_s15, %s237_s6  ;;  %p243_p13 = scmp.lt.s32.totalorder %s237_s6, %s237_s6 }
  0x1b   :  { %p244_p0 = por %p243_p13, %p242_p12 }
  0x1d   :  { %p245_p1 = pnand %p244_p0, %p238_p11 }
  0x1f   :  { %248 = shalt.err (!%p245_p1)
}
  0x20   :  { %s255_s0 = smov 128   ;;  %s256_s7 = smov 8  }
  0x21   :  { %31 = dma.hbm_to_vmem [thread:$0]  %s318_s1, 512, %s280_s15, [#allocation6], %s255_s0, %s255_s0, %s256_s7  }
  0x22   :  { %249 = dma.done.wait [#allocation4], 128  }
  0x23   :  { %250 = vsyncadd [#allocation4], 4294967168 }
  0x24   :  { %251 = dma.done.wait [#allocation6], 512  }
  0x25   :  { %252 = vsyncadd [#allocation6], 4294966784  ;;  %v257_v0 = vmov 0.0|0.0   ;;  %vm258_vm0 = vmmov 0   ;;  %v259_v1 = vmov 0.0   ;;  %v47_v2 = vld [vmem:[#allocation5] sm:$0xff]  ;;  %v139_v19 = vlaneseq }
  0x26   :  { %188 = vmatprep.subr.bf16.mxu0 %v257_v0  ;;  %185 = vmatprep.mubr.msk.f32.mxu0 %vm258_vm0, %v259_v1  ;;  %v48_v3 = vld [vmem:[#allocation5 + $0x8] sm:$0xff]  ;;  %v49_v4 = vld [vmem:[#allocation5 + $0x10] sm:$0xff]  ;;  %v50_v6 = vld [vmem:[#allocation5 + $0x18] sm:$0xff]  ;;  %vm51_vm1 = vcmask 261120  }
  0x27   :  { %v189_v5 = vpack.c.bf16 %v48_v3, %v47_v2  ;;  %v192_v7 = vpack.c.bf16 %v50_v6, %v49_v4  ;;  %v46_v8 = vld [vmem:[#allocation3] sm:$0xff]  ;;  %v140_v22 = vand.u32 127, %v139_v19 }
  0x28   :  { %v171_v9 = vld [vmem:[%s319_s2] ss:$0 sm:$0xff] }
  0x29   :  { %190 = vmatpush3.bf16.msra.mxu0 %v189_v5  ;;  %vm141_vm3 = vcmp.lt.s32.totalorder %v140_v22, 2  ;;  %vm142_vm4 = vcmp.ge.s32.totalorder %v140_v22, 4  ;;  %vm143_vm5 = vcmp.lt.s32.totalorder %v140_v22, 6 }
  0x2a   :  { %191 = vmatprep.subr.bf16.mxu0 %v257_v0  ;;  %vm144_vm6 = vmand %vm142_vm4, %vm143_vm5 }
  0x2d   :  { %193 = vmatpush3.bf16.msra.mxu0 %v192_v7 }
  0x30   :  { %186 = vmatmul.mubr.msk.f32.vlgmr.msra.gmra.mrb[0].mxu0 %vm51_vm1, %v46_v8 }
 0x103   :  { %v121_v10 = vpop.f32.mrb[0].mxu0 }
 0x104   :  { %v138_v11 = vadd.f32 %v171_v9, %v121_v10  ;;  %v187_v12 = vpop.f32.mrb[1].mxu0 }
 0x106   :  { %v146_v13 = vand.u32 2147483647, %v138_v11  ;;  %v145_v26 = vmax.f32 %v138_v11, 0.0 }
 0x108   :  { %v147_v14 = vsub.f32 0.0, %v146_v13 }
 0x10a   :  { %v148_v15 = vmul.f32 1.442695, %v147_v14 }
 0x10c   :  { %201 = vpow2.f32 %v148_v15 }
 0x116   :  { %v202_v16 = vpop.eup %201 }
 0x117   :  { %v150_v17 = vadd.f32 1.0, %v202_v16  ;;  %v153_v18 = vmul.f32 -0.5, %v202_v16  ;;  %v156_v21 = vand.u32 2147483647, %v202_v16 }
 0x119   :  { %203 = vlog2.f32 %v150_v17  ;;  %v154_v20 = vadd.f32 1.0, %v153_v18  ;;  %vm157_vm2 = vcmp.lt.f32.partialorder %v156_v21, 0.0004427343 }
 0x11b   :  { %v155_v25 = vmul.f32 %v202_v16, %v154_v20 }
 0x123   :  { %v204_v23 = vpop.eup %203 }
 0x124   :  { %v152_v24 = vmul.f32 0.6931472, %v204_v23 }
 0x126   :  { %v158_v27 = vsel %vm157_vm2, %v155_v25, %v152_v24 }
 0x127   :  { %v159_v28 = vadd.f32 %v158_v27, %v145_v26 }
 0x129   :  { %v160_v29 = vsel %vm141_vm3, %v138_v11, %v159_v28 }
 0x12a   :  { %v161_v30 = vadd.f32 2.0, %v160_v29 }
 0x12c   :  { %v162_v31 = vsel %vm144_vm6, %v161_v30, %v160_v29 }
 0x12d   :  { %163 = vst [vmem:[%s320_s3] sm:$0xff] %v162_v31 }
 0x12e   :  { %168 = vsyncpa [#allocation4], 1 }
 0x12f   :  { %169 = vsyncpa [#allocation6], 1 }

</bundles_post_ra>
